<compile_context>
chip_gen: v6e
topology: v6e:2x2x1
jax: 0.10.0
libtpu: 0.0.40
codegen_flags: <defaults>
</compile_context>

<pallas_src>
import functools

import jax
import jax.numpy as jnp
from jax.experimental import pallas as pl
from jax.experimental.pallas import tpu as pltpu

NEG_BIG = -1e30  # finite "minus infinity" (avoids inf-inf NaN in online max)


def transgat_kernel(x_ref, ea_ref, S_ref, T_ref, P_ref,
                    Wl_ref, Ws_ref, We1_ref, be1_ref, We2_ref, be2_ref,
                    att_ref, Wc1_ref, bc1_ref, Wc2_ref, bc2_ref,
                    xout_ref, rep_ref, logit_ref,
                    xt_ref, agg_ref, m_ref,
                    *, e_total, tile_e, dp):
    f32 = jnp.float32
    e = pl.program_id(0)

    # ---- init (first edge tile): node transform + accumulators ----
    @pl.when(e == 0)
    def _init():
        xt_ref[...] = jnp.dot(x_ref[...], Wl_ref[...], preferred_element_type=f32)
        agg_ref[...] = jnp.zeros_like(agg_ref)
        m_ref[...] = jnp.full((1, 1), NEG_BIG, f32)

    # ---- per-edge-tile work ----
    S = S_ref[...].astype(f32)          # [tE, N] one-hot (bf16 in HBM, exact)
    T = T_ref[...].astype(f32)          # [tE, N]

    # edge encoder MLP: Linear -> ReLU -> Linear   : [tE, Dp]
    h = jnp.dot(ea_ref[...], We1_ref[...], preferred_element_type=f32) + be1_ref[...]
    h = jnp.maximum(h, 0.0)
    e_trans = jnp.dot(h, We2_ref[...], preferred_element_type=f32) + be2_ref[...]

    # message: x_j = x_trans[src] + edge_attr_trans   (gather as one-hot matmul)
    x_j = jnp.dot(S, xt_ref[...], preferred_element_type=f32) + e_trans   # [tE, Dp]

    # attention logits: (x_j * att).sum(-1), leaky_relu(0.2)
    alpha = jnp.sum(x_j * att_ref[...], axis=-1, keepdims=True)           # [tE, 1]
    alpha = jnp.where(alpha > 0, alpha, 0.2 * alpha)

    # mask padded edge rows so they never affect the global max
    rows = e * tile_e + jax.lax.broadcasted_iota(jnp.int32, (tile_e, 1), 0)
    alpha = jnp.where(rows < e_total, alpha, NEG_BIG)

    # online global-max stabilizer (EdgeSoftmax subtracts the max over ALL edges)
    m_old = m_ref[...]                                                    # [1, 1]
    m_new = jnp.maximum(m_old, jnp.max(alpha, axis=0, keepdims=True))
    scale = jnp.exp(m_old - m_new)                                        # [1, 1]
    p = jnp.exp(alpha - m_new)                                            # [tE, 1]
    # TODO(synk): F.dropout(p=0.1) on the attention weights is an inference no-op.

    # stash exp(alpha) into the last zero-padded lane so one scatter matmul
    # yields both the unnormalized aggregate and the per-node denominator.
    marker = (jax.lax.broadcasted_iota(jnp.int32, (1, dp), 1) == dp - 1).astype(f32)
    msg = (x_j + marker) * p                                              # [tE, Dp]

    # scatter-add by target: T^T @ msg, expressed as dot_general over dim 0
    upd = jax.lax.dot_general(T, msg, (((0,), (0,)), ((), ())),
                              preferred_element_type=f32)                 # [N, Dp]
    agg_ref[...] = agg_ref[...] * scale + upd
    m_ref[...] = m_new

    # ---- finalize (last edge tile): normalize, skip, pool, classify ----
    @pl.when(e == pl.num_programs(0) - 1)
    def _finalize():
        agg = agg_ref[...]
        denom = jnp.sum(agg * marker, axis=-1, keepdims=True)             # [N, 1]
        # exact divide keeps the 1e-4 tolerance; pl.reciprocal(approx=True)
        # is a further EUP win if tolerance allows.
        inv = 1.0 / (denom + 1e-16)
        skip = jnp.dot(x_ref[...], Ws_ref[...], preferred_element_type=f32)
        x_out = agg * inv * (1.0 - marker) + skip                         # [N, Dp]
        xout_ref[...] = x_out

        # global_mean_pool (P rows are 1/|graph|)
        reps = jnp.dot(P_ref[...], x_out, preferred_element_type=f32)     # [G, Dp]
        rep_ref[...] = reps

        # classifier: Linear -> ReLU -> Linear (all padded to Dp lanes)
        c = jnp.maximum(
            jnp.dot(reps, Wc1_ref[...], preferred_element_type=f32) + bc1_ref[...], 0.0)
        logit_ref[...] = jnp.dot(c, Wc2_ref[...], preferred_element_type=f32) + bc2_ref[...]


def transgat_forward(x, edge_attr, S, T, P, params, hidden_channels, out_channels,
                     *, edge_tile=512):
    f32 = jnp.float32
    N, F_in = x.shape
    E, F_e = edge_attr.shape
    G = P.shape[0]
    D = hidden_channels
    C = out_channels
    Dp = max(128, ((D + 127) // 128) * 128)          # lane-dense / MXU-friendly width

    # edge tiling (rows padded with zeros; zero one-hot rows scatter nothing,
    # and their attention logits are masked to NEG_BIG inside the kernel)
    tE = max(8, (min(edge_tile, ((E + 7) // 8) * 8) // 8) * 8)
    E_pad = ((E + tE - 1) // tE) * tE
    n_tiles = E_pad // tE

    pad_rows = lambda a, r: jnp.pad(a, ((0, r - a.shape[0]), (0, 0)))
    pad_to = lambda a, s: jnp.pad(a, tuple((0, t - d) for t, d in zip(s, a.shape)))

    ea_p = pad_rows(edge_attr.astype(f32), E_pad)
    S_p = pad_rows(S.astype(f32), E_pad).astype(jnp.bfloat16)   # 0/1 exact in bf16
    T_p = pad_rows(T.astype(f32), E_pad).astype(jnp.bfloat16)

    # zero-pad the hidden dimension of every parameter to Dp (exact numerics)
    Wl = pad_to(params["Wl"], (F_in, Dp));   Ws = pad_to(params["Ws"], (F_in, Dp))
    We1 = pad_to(params["We1"], (F_e, Dp));  be1 = pad_to(params["be1"], (1, Dp))
    We2 = pad_to(params["We2"], (Dp, Dp));   be2 = pad_to(params["be2"], (1, Dp))
    att = pad_to(params["att"], (1, Dp))
    Wc1 = pad_to(params["Wc1"], (Dp, Dp));   bc1 = pad_to(params["bc1"], (1, Dp))
    Wc2 = pad_to(params["Wc2"], (Dp, Dp));   bc2 = pad_to(params["bc2"], (1, Dp))

    kernel = functools.partial(transgat_kernel, e_total=E, tile_e=tE, dp=Dp)

    const = lambda e: (0, 0)
    edge_map = lambda e: (e, 0)
    full = lambda a: pl.BlockSpec(a.shape, const)

    weights = (Wl, Ws, We1, be1, We2, be2, att, Wc1, bc1, Wc2, bc2)
    inputs = (x.astype(f32), ea_p, S_p, T_p, P.astype(f32)) + weights

    in_specs = [
        pl.BlockSpec((N, F_in), const),      # x: resident across all edge tiles
        pl.BlockSpec((tE, F_e), edge_map),   # edge_attr, tiled over edges
        pl.BlockSpec((tE, N), edge_map),     # S (src one-hot), tiled over edges
        pl.BlockSpec((tE, N), edge_map),     # T (tgt one-hot), tiled over edges
        pl.BlockSpec((G, N), const),         # mean-pool operator
    ] + [full(w) for w in weights]

    out_specs = (
        pl.BlockSpec((N, Dp), const),
        pl.BlockSpec((G, Dp), const),
        pl.BlockSpec((G, Dp), const),
    )

    flops = int(2 * E_pad * N * Dp * 2                 # gather + scatter matmuls
                + 2 * E_pad * (F_e * Dp + Dp * Dp)     # edge MLP
                + 2 * N * F_in * Dp * 2                # lin + skip
                + 2 * G * N * Dp + 4 * G * Dp * Dp)    # pool + classifier
    bytes_accessed = int(sum(a.size * a.dtype.itemsize for a in inputs)
                         + (N * Dp + 2 * G * Dp) * 4)
    cost = pl.CostEstimate(flops=flops, transcendentals=int(E_pad),
                           bytes_accessed=bytes_accessed)

    xo, rp, lg = pl.pallas_call(
        kernel,
        out_shape=(
            jax.ShapeDtypeStruct((N, Dp), f32),
            jax.ShapeDtypeStruct((G, Dp), f32),
            jax.ShapeDtypeStruct((G, Dp), f32),
        ),
        grid=(n_tiles,),
        in_specs=in_specs,
        out_specs=out_specs,
        scratch_shapes=[
            pltpu.VMEM((N, Dp), f32),   # x_trans (computed once, reused per tile)
            pltpu.VMEM((N, Dp), f32),   # fused [aggregate | denominator] accumulator
            pltpu.VMEM((1, 1), f32),    # running global max of attention logits
        ],
        compiler_params=pltpu.CompilerParams(dimension_semantics=("arbitrary",)),
        cost_estimate=cost,
    )(*inputs)

    return xo[:, :D], rp[:, :D], lg[:, :C]


def xavier_uniform(key, fan_in, fan_out):
    a = (6.0 / (fan_in + fan_out)) ** 0.5
    return jax.random.uniform(key, (fan_in, fan_out), jnp.float32, -a, a)


def reference(x, edge_attr, src, dst, batch, counts, params, G):
    # pure-JAX reference of the PyTorch forward (eval mode, heads = 1)
    x_trans = x @ params["Wl"]
    e_trans = jnp.maximum(edge_attr @ params["We1"] + params["be1"], 0.0) @ params["We2"] + params["be2"]
    x_j = x_trans[src] + e_trans
    alpha = jnp.sum(x_j * params["att"], axis=-1)
    alpha = jnp.where(alpha > 0, alpha, 0.2 * alpha)
    alpha = alpha - jnp.max(alpha, axis=0, keepdims=True)
    exp_a = jnp.exp(alpha)
    denom = jnp.zeros((x.shape[0],), jnp.float32).at[dst].add(exp_a)
    alpha_n = exp_a / (denom[dst] + 1e-16)
    agg = jnp.zeros((x.shape[0], x_trans.shape[1]), jnp.float32).at[dst].add(x_j * alpha_n[:, None])
    x_out = agg + x @ params["Ws"]
    reps = jnp.zeros((G, x_out.shape[1]), jnp.float32).at[batch].add(x_out) / counts[:, None]
    c = jnp.maximum(reps @ params["Wc1"] + params["bc1"], 0.0)
    logits = c @ params["Wc2"] + params["bc2"]
    return x_out, reps, logits


if __name__ == "__main__":
    key = jax.random.PRNGKey(0)
    # module config (num_heads = 1, the transGAT default)
    N, G = 8, 2                 # nodes, graphs
    F_in, F_e = 4, 6            # num_node_features, num_edge_features
    D, C_out = 32, 3            # hidden_channels, out_channels

    ks = jax.random.split(key, 16)

    # node features, edge connectivity (no self loops), edge features, batch
    x = jax.random.normal(ks[0], (N, F_in), jnp.float32)
    src0 = jnp.array([0, 1, 1, 2, 3, 0, 4, 5, 5, 6, 7, 4], dtype=jnp.int32)
    dst0 = jnp.array([1, 0, 2, 3, 0, 3, 5, 4, 6, 7, 4, 6], dtype=jnp.int32)
    ea0 = jax.random.normal(ks[1], (src0.shape[0], F_e), jnp.float32)
    batch = jnp.array([0, 0, 0, 0, 1, 1, 1, 1], dtype=jnp.int32)

    # remove_self_loops (none present) + add_self_loops(fill_value=0.0)
    loop = jnp.arange(N, dtype=jnp.int32)
    src = jnp.concatenate([src0, loop])
    dst = jnp.concatenate([dst0, loop])
    edge_attr = jnp.concatenate([ea0, jnp.zeros((N, F_e), jnp.float32)], axis=0)

    # one-hot gather/scatter operators and mean-pool operator (glue)
    node_ids = jnp.arange(N, dtype=jnp.int32)
    S = (src[:, None] == node_ids[None, :]).astype(jnp.float32)       # [E, N]
    T = (dst[:, None] == node_ids[None, :]).astype(jnp.float32)       # [E, N]
    Bmat = (jnp.arange(G, dtype=jnp.int32)[:, None] == batch[None, :]).astype(jnp.float32)
    counts = jnp.sum(Bmat, axis=1)
    P = Bmat / counts[:, None]                                        # [G, N]

    # deterministic parameters (PyTorch Linear stored transposed: [in, out])
    params = {
        "Wl":  xavier_uniform(ks[2], F_in, D),                        # lin (no bias)
        "Ws":  xavier_uniform(ks[3], F_in, D),                        # skip (no bias)
        "We1": xavier_uniform(ks[4], F_e, D),
        "be1": 0.05 * jax.random.normal(ks[5], (1, D), jnp.float32),
        "We2": xavier_uniform(ks[6], D, D),
        "be2": 0.05 * jax.random.normal(ks[7], (1, D), jnp.float32),
        "att": ((2.0 / (1 + D)) ** 0.5) * jax.random.normal(ks[8], (1, D), jnp.float32),
        "Wc1": xavier_uniform(ks[9], D, D),
        "bc1": 0.05 * jax.random.normal(ks[10], (1, D), jnp.float32),
        "Wc2": xavier_uniform(ks[11], D, C_out),
        "bc2": 0.05 * jax.random.normal(ks[12], (1, C_out), jnp.float32),
    }

    # edge_tile=8 exercises the multi-tile accumulator / online-max path
    x_enc, reps, logits = transgat_forward(x, edge_attr, S, T, P, params,
                                           D, C_out, edge_tile=8)
    jax.block_until_ready((x_enc, reps, logits))

    # correctness check against pure-JAX reference
    x_ref, r_ref, l_ref = reference(x, edge_attr, src, dst, batch, counts, params, G)
    assert jnp.allclose(x_enc, x_ref, atol=1e-4, rtol=1e-4)
    assert jnp.allclose(reps, r_ref, atol=1e-4, rtol=1e-4)
    assert jnp.allclose(logits, l_ref, atol=1e-4, rtol=1e-4)

    print("KERNEL_OK")
</pallas_src>

<mosaic_0001>
module attributes {stable_mosaic.version = 11 : i64} {
  func.func @transgat_kernel(%arg0: i32, %arg1: memref<8x4xf32, #tpu.memory_space<vmem>>, %arg2: memref<8x6xf32, #tpu.memory_space<vmem>>, %arg3: memref<8x8xbf16, #tpu.memory_space<vmem>>, %arg4: memref<8x8xbf16, #tpu.memory_space<vmem>>, %arg5: memref<2x8xf32, #tpu.memory_space<vmem>>, %arg6: memref<4x128xf32, #tpu.memory_space<vmem>>, %arg7: memref<4x128xf32, #tpu.memory_space<vmem>>, %arg8: memref<6x128xf32, #tpu.memory_space<vmem>>, %arg9: memref<1x128xf32, #tpu.memory_space<vmem>>, %arg10: memref<128x128xf32, #tpu.memory_space<vmem>>, %arg11: memref<1x128xf32, #tpu.memory_space<vmem>>, %arg12: memref<1x128xf32, #tpu.memory_space<vmem>>, %arg13: memref<128x128xf32, #tpu.memory_space<vmem>>, %arg14: memref<1x128xf32, #tpu.memory_space<vmem>>, %arg15: memref<128x128xf32, #tpu.memory_space<vmem>>, %arg16: memref<1x128xf32, #tpu.memory_space<vmem>>, %arg17: memref<8x128xf32, #tpu.memory_space<vmem>>, %arg18: memref<2x128xf32, #tpu.memory_space<vmem>>, %arg19: memref<2x128xf32, #tpu.memory_space<vmem>>, %arg20: memref<8x128xf32, #tpu.memory_space<vmem>>, %arg21: memref<8x128xf32, #tpu.memory_space<vmem>>, %arg22: memref<1x1xf32, #tpu.memory_space<vmem>>) attributes {dimension_semantics = [#tpu.dimension_semantics<arbitrary>], iteration_bounds = array<i64: 3>, scalar_prefetch = 0 : i64, scratch_operands = 3 : i64, tpu.core_type = #tpu.core_type<tc>, window_params = [{pipeline_mode = #tpu.pipeline_mode<synchronous>, transform_indices = @transform_0, window_bounds = array<i64: 8, 4>}, {transform_indices = @transform_1, window_bounds = array<i64: 8, 6>}, {transform_indices = @transform_2, window_bounds = array<i64: 8, 8>}, {transform_indices = @transform_3, window_bounds = array<i64: 8, 8>}, {pipeline_mode = #tpu.pipeline_mode<synchronous>, transform_indices = @transform_4, window_bounds = array<i64: 2, 8>}, {pipeline_mode = #tpu.pipeline_mode<synchronous>, transform_indices = @transform_5, window_bounds = array<i64: 4, 128>}, {pipeline_mode = #tpu.pipeline_mode<synchronous>, transform_indices = @transform_6, window_bounds = array<i64: 4, 128>}, {pipeline_mode = #tpu.pipeline_mode<synchronous>, transform_indices = @transform_7, window_bounds = array<i64: 6, 128>}, {pipeline_mode = #tpu.pipeline_mode<synchronous>, transform_indices = @transform_8, window_bounds = array<i64: 1, 128>}, {pipeline_mode = #tpu.pipeline_mode<synchronous>, transform_indices = @transform_9, window_bounds = array<i64: 128, 128>}, {pipeline_mode = #tpu.pipeline_mode<synchronous>, transform_indices = @transform_10, window_bounds = array<i64: 1, 128>}, {pipeline_mode = #tpu.pipeline_mode<synchronous>, transform_indices = @transform_11, window_bounds = array<i64: 1, 128>}, {pipeline_mode = #tpu.pipeline_mode<synchronous>, transform_indices = @transform_12, window_bounds = array<i64: 128, 128>}, {pipeline_mode = #tpu.pipeline_mode<synchronous>, transform_indices = @transform_13, window_bounds = array<i64: 1, 128>}, {pipeline_mode = #tpu.pipeline_mode<synchronous>, transform_indices = @transform_14, window_bounds = array<i64: 128, 128>}, {pipeline_mode = #tpu.pipeline_mode<synchronous>, transform_indices = @transform_15, window_bounds = array<i64: 1, 128>}, {pipeline_mode = #tpu.pipeline_mode<synchronous>, transform_indices = @transform_16, window_bounds = array<i64: 8, 128>}, {pipeline_mode = #tpu.pipeline_mode<synchronous>, transform_indices = @transform_17, window_bounds = array<i64: 2, 128>}, {pipeline_mode = #tpu.pipeline_mode<synchronous>, transform_indices = @transform_18, window_bounds = array<i64: 2, 128>}]} {
    %c0_i32 = arith.constant 0 : i32
    %0 = arith.cmpi eq, %arg0, %c0_i32 : i32
    %1 = arith.extui %0 : i1 to i32
    %c0_i32_0 = arith.constant 0 : i32
    %2 = arith.cmpi ne, %1, %c0_i32_0 : i32
    scf.if %2 {
      %c0_36 = arith.constant 0 : index
      %c0_37 = arith.constant 0 : index
      %69 = vector.load %arg1[%c0_36, %c0_37] : memref<8x4xf32, #tpu.memory_space<vmem>>, vector<8x4xf32>
      %c0_38 = arith.constant 0 : index
      %c0_39 = arith.constant 0 : index
      %70 = vector.load %arg6[%c0_38, %c0_39] : memref<4x128xf32, #tpu.memory_space<vmem>>, vector<4x128xf32>
      %cst_40 = arith.constant dense<0.000000e+00> : vector<8x128xf32>
      %71 = tpu.matmul %69, %70, %cst_40 {dimension_numbers = #tpu.dot_dimension_numbers<[1], [0], [0], [1], [0, 0, 1, 1], [], []>} : vector<8x4xf32>, vector<4x128xf32>, vector<8x128xf32> -> vector<8x128xf32>
      %c0_41 = arith.constant 0 : index
      %c0_42 = arith.constant 0 : index
      %72 = vector.load %arg20[%c0_41, %c0_42] : memref<8x128xf32, #tpu.memory_space<vmem>>, vector<8x128xf32>
      tpu.vector_store %arg20[%c0_41, %c0_42], %71 {strides = array<i32>} : memref<8x128xf32, #tpu.memory_space<vmem>>, vector<8x128xf32>,
      %cst_43 = arith.constant 0.000000e+00 : f32
      %73 = vector.broadcast %cst_43 : f32 to vector<8x128xf32>
      %c0_44 = arith.constant 0 : index
      %c0_45 = arith.constant 0 : index
      %74 = vector.load %arg21[%c0_44, %c0_45] : memref<8x128xf32, #tpu.memory_space<vmem>>, vector<8x128xf32>
      tpu.vector_store %arg21[%c0_44, %c0_45], %73 {strides = array<i32>} : memref<8x128xf32, #tpu.memory_space<vmem>>, vector<8x128xf32>,
      %cst_46 = arith.constant -1.000000e+30 : f32
      %75 = vector.broadcast %cst_46 : f32 to vector<1x1xf32>
      %c0_47 = arith.constant 0 : index
      %c0_48 = arith.constant 0 : index
      %76 = vector.load %arg22[%c0_47, %c0_48] : memref<1x1xf32, #tpu.memory_space<vmem>>, vector<1x1xf32>
      tpu.vector_store %arg22[%c0_47, %c0_48], %75 {strides = array<i32>} : memref<1x1xf32, #tpu.memory_space<vmem>>, vector<1x1xf32>,
    } else {
    }
    %c0 = arith.constant 0 : index
    %c0_1 = arith.constant 0 : index
    %3 = vector.load %arg3[%c0, %c0_1] : memref<8x8xbf16, #tpu.memory_space<vmem>>, vector<8x8xbf16>
    %4 = arith.extf %3 : vector<8x8xbf16> to vector<8x8xf32>
    %c0_2 = arith.constant 0 : index
    %c0_3 = arith.constant 0 : index
    %5 = vector.load %arg4[%c0_2, %c0_3] : memref<8x8xbf16, #tpu.memory_space<vmem>>, vector<8x8xbf16>
    %6 = arith.extf %5 : vector<8x8xbf16> to vector<8x8xf32>
    %c0_4 = arith.constant 0 : index
    %c0_5 = arith.constant 0 : index
    %7 = vector.load %arg2[%c0_4, %c0_5] : memref<8x6xf32, #tpu.memory_space<vmem>>, vector<8x6xf32>
    %c0_6 = arith.constant 0 : index
    %c0_7 = arith.constant 0 : index
    %8 = vector.load %arg8[%c0_6, %c0_7] : memref<6x128xf32, #tpu.memory_space<vmem>>, vector<6x128xf32>
    %cst = arith.constant dense<0.000000e+00> : vector<8x128xf32>
    %9 = tpu.matmul %7, %8, %cst {dimension_numbers = #tpu.dot_dimension_numbers<[1], [0], [0], [1], [0, 0, 1, 1], [], []>} : vector<8x6xf32>, vector<6x128xf32>, vector<8x128xf32> -> vector<8x128xf32>
    %c0_8 = arith.constant 0 : index
    %c0_9 = arith.constant 0 : index
    %10 = vector.load %arg9[%c0_8, %c0_9] : memref<1x128xf32, #tpu.memory_space<vmem>>, vector<1x128xf32>
    %11 = vector.broadcast %10 : vector<1x128xf32> to vector<8x128xf32>
    %12 = arith.addf %9, %11 : vector<8x128xf32>
    %cst_10 = arith.constant 0.000000e+00 : f32
    %13 = vector.broadcast %cst_10 : f32 to vector<8x128xf32>
    %14 = arith.maximumf %12, %13 : vector<8x128xf32>
    %c0_11 = arith.constant 0 : index
    %c0_12 = arith.constant 0 : index
    %15 = vector.load %arg10[%c0_11, %c0_12] : memref<128x128xf32, #tpu.memory_space<vmem>>, vector<128x128xf32>
    %cst_13 = arith.constant dense<0.000000e+00> : vector<8x128xf32>
    %16 = tpu.matmul %14, %15, %cst_13 {dimension_numbers = #tpu.dot_dimension_numbers<[1], [0], [0], [1], [0, 0, 1, 1], [], []>} : vector<8x128xf32>, vector<128x128xf32>, vector<8x128xf32> -> vector<8x128xf32>
    %c0_14 = arith.constant 0 : index
    %c0_15 = arith.constant 0 : index
    %17 = vector.load %arg11[%c0_14, %c0_15] : memref<1x128xf32, #tpu.memory_space<vmem>>, vector<1x128xf32>
    %18 = vector.broadcast %17 : vector<1x128xf32> to vector<8x128xf32>
    %19 = arith.addf %16, %18 : vector<8x128xf32>
    %c0_16 = arith.constant 0 : index
    %c0_17 = arith.constant 0 : index
    %20 = vector.load %arg20[%c0_16, %c0_17] : memref<8x128xf32, #tpu.memory_space<vmem>>, vector<8x128xf32>
    %cst_18 = arith.constant dense<0.000000e+00> : vector<8x128xf32>
    %21 = tpu.matmul %4, %20, %cst_18 {dimension_numbers = #tpu.dot_dimension_numbers<[1], [0], [0], [1], [0, 0, 1, 1], [], []>} : vector<8x8xf32>, vector<8x128xf32>, vector<8x128xf32> -> vector<8x128xf32>
    %22 = arith.addf %21, %19 : vector<8x128xf32>
    %c0_19 = arith.constant 0 : index
    %c0_20 = arith.constant 0 : index
    %23 = vector.load %arg12[%c0_19, %c0_20] : memref<1x128xf32, #tpu.memory_space<vmem>>, vector<1x128xf32>
    %24 = vector.broadcast %23 : vector<1x128xf32> to vector<8x128xf32>
    %25 = arith.mulf %22, %24 : vector<8x128xf32>
    %cst_21 = arith.constant dense<0.000000e+00> : vector<8xf32>
    %26 = vector.multi_reduction <add>, %25, %cst_21 [1] : vector<8x128xf32> to vector<8xf32>
    %27 = vector.shape_cast %26 : vector<8xf32> to vector<8x1xf32>
    %cst_22 = arith.constant 0.000000e+00 : f32
    %28 = vector.broadcast %cst_22 : f32 to vector<8x1xf32>
    %29 = arith.cmpf ogt, %27, %28 : vector<8x1xf32>
    %cst_23 = arith.constant 2.000000e-01 : f32
    %30 = vector.broadcast %cst_23 : f32 to vector<8x1xf32>
    %31 = arith.mulf %30, %27 : vector<8x1xf32>
    %32 = arith.select %29, %27, %31 : vector<8x1xi1>, vector<8x1xf32>
    %c8_i32 = arith.constant 8 : i32
    %33 = arith.muli %arg0, %c8_i32 : i32
    %34 = tpu.iota {dimensions = array<i32: 0>} : vector<8x1xi32>
    %35 = vector.broadcast %33 : i32 to vector<8x1xi32>
    %36 = arith.addi %35, %34 : vector<8x1xi32>
    %c20_i32 = arith.constant 20 : i32
    %37 = vector.broadcast %c20_i32 : i32 to vector<8x1xi32>
    %38 = arith.cmpi slt, %36, %37 : vector<8x1xi32>
    %cst_24 = arith.constant -1.000000e+30 : f32
    %39 = vector.broadcast %cst_24 : f32 to vector<8x1xf32>
    %40 = arith.select %38, %32, %39 : vector<8x1xi1>, vector<8x1xf32>
    %c0_25 = arith.constant 0 : index
    %c0_26 = arith.constant 0 : index
    %41 = vector.load %arg22[%c0_25, %c0_26] : memref<1x1xf32, #tpu.memory_space<vmem>>, vector<1x1xf32>
    %cst_27 = arith.constant dense<0xFF800000> : vector<1xf32>
    %42 = vector.multi_reduction <maximumf>, %40, %cst_27 [0] : vector<8x1xf32> to vector<1xf32>
    %43 = vector.shape_cast %42 : vector<1xf32> to vector<1x1xf32>
    %44 = arith.maximumf %41, %43 : vector<1x1xf32>
    %45 = arith.subf %41, %44 : vector<1x1xf32>
    %46 = math.exp %45 : vector<1x1xf32>
    %47 = vector.broadcast %44 : vector<1x1xf32> to vector<8x1xf32>
    %48 = arith.subf %40, %47 : vector<8x1xf32>
    %49 = math.exp %48 : vector<8x1xf32>
    %50 = tpu.iota {dimensions = array<i32: 1>} : vector<1x128xi32>
    %c127_i32 = arith.constant 127 : i32
    %51 = vector.broadcast %c127_i32 : i32 to vector<1x128xi32>
    %52 = arith.cmpi eq, %50, %51 : vector<1x128xi32>
    %53 = arith.extui %52 : vector<1x128xi1> to vector<1x128xi32>
    %54 = arith.sitofp %53 : vector<1x128xi32> to vector<1x128xf32>
    %55 = vector.broadcast %54 : vector<1x128xf32> to vector<8x128xf32>
    %56 = arith.addf %22, %55 : vector<8x128xf32>
    %57 = vector.broadcast %49 : vector<8x1xf32> to vector<8x128xf32>
    %58 = arith.mulf %56, %57 : vector<8x128xf32>
    %cst_28 = arith.constant dense<0.000000e+00> : vector<8x128xf32>
    %59 = tpu.matmul %6, %58, %cst_28 {dimension_numbers = #tpu.dot_dimension_numbers<[0], [0], [1], [1], [0, 1, 1, 1], [], []>} : vector<8x8xf32>, vector<8x128xf32>, vector<8x128xf32> -> vector<8x128xf32>
    %c0_29 = arith.constant 0 : index
    %c0_30 = arith.constant 0 : index
    %60 = vector.load %arg21[%c0_29, %c0_30] : memref<8x128xf32, #tpu.memory_space<vmem>>, vector<8x128xf32>
    %61 = vector.broadcast %46 : vector<1x1xf32> to vector<8x128xf32>
    %62 = arith.mulf %60, %61 : vector<8x128xf32>
    %63 = arith.addf %62, %59 : vector<8x128xf32>
    %c0_31 = arith.constant 0 : index
    %c0_32 = arith.constant 0 : index
    %64 = vector.load %arg21[%c0_31, %c0_32] : memref<8x128xf32, #tpu.memory_space<vmem>>, vector<8x128xf32>
    tpu.vector_store %arg21[%c0_31, %c0_32], %63 {strides = array<i32>} : memref<8x128xf32, #tpu.memory_space<vmem>>, vector<8x128xf32>,
    %c0_33 = arith.constant 0 : index
    %c0_34 = arith.constant 0 : index
    %65 = vector.load %arg22[%c0_33, %c0_34] : memref<1x1xf32, #tpu.memory_space<vmem>>, vector<1x1xf32>
    tpu.vector_store %arg22[%c0_33, %c0_34], %44 {strides = array<i32>} : memref<1x1xf32, #tpu.memory_space<vmem>>, vector<1x1xf32>,
    %c2_i32 = arith.constant 2 : i32
    %66 = arith.cmpi eq, %arg0, %c2_i32 : i32
    %67 = arith.extui %66 : i1 to i32
    %c0_i32_35 = arith.constant 0 : i32
    %68 = arith.cmpi ne, %67, %c0_i32_35 : i32
    scf.if %68 {
      %c0_36 = arith.constant 0 : index
      %c0_37 = arith.constant 0 : index
      %69 = vector.load %arg21[%c0_36, %c0_37] : memref<8x128xf32, #tpu.memory_space<vmem>>, vector<8x128xf32>
      %70 = vector.broadcast %54 : vector<1x128xf32> to vector<8x128xf32>
      %71 = arith.mulf %69, %70 : vector<8x128xf32>
      %cst_38 = arith.constant dense<0.000000e+00> : vector<8xf32>
      %72 = vector.multi_reduction <add>, %71, %cst_38 [1] : vector<8x128xf32> to vector<8xf32>
      %73 = vector.shape_cast %72 : vector<8xf32> to vector<8x1xf32>
      %cst_39 = arith.constant 1.000000e-16 : f32
      %74 = vector.broadcast %cst_39 : f32 to vector<8x1xf32>
      %75 = arith.addf %73, %74 : vector<8x1xf32>
      %cst_40 = arith.constant 1.000000e+00 : f32
      %76 = vector.broadcast %cst_40 : f32 to vector<8x1xf32>
      %77 = arith.divf %76, %75 : vector<8x1xf32>
      %c0_41 = arith.constant 0 : index
      %c0_42 = arith.constant 0 : index
      %78 = vector.load %arg1[%c0_41, %c0_42] : memref<8x4xf32, #tpu.memory_space<vmem>>, vector<8x4xf32>
      %c0_43 = arith.constant 0 : index
      %c0_44 = arith.constant 0 : index
      %79 = vector.load %arg7[%c0_43, %c0_44] : memref<4x128xf32, #tpu.memory_space<vmem>>, vector<4x128xf32>
      %cst_45 = arith.constant dense<0.000000e+00> : vector<8x128xf32>
      %80 = tpu.matmul %78, %79, %cst_45 {dimension_numbers = #tpu.dot_dimension_numbers<[1], [0], [0], [1], [0, 0, 1, 1], [], []>} : vector<8x4xf32>, vector<4x128xf32>, vector<8x128xf32> -> vector<8x128xf32>
      %81 = vector.broadcast %77 : vector<8x1xf32> to vector<8x128xf32>
      %82 = arith.mulf %69, %81 : vector<8x128xf32>
      %cst_46 = arith.constant 1.000000e+00 : f32
      %83 = vector.broadcast %cst_46 : f32 to vector<1x128xf32>
      %84 = arith.subf %83, %54 : vector<1x128xf32>
      %85 = vector.broadcast %84 : vector<1x128xf32> to vector<8x128xf32>
      %86 = arith.mulf %82, %85 : vector<8x128xf32>
      %87 = arith.addf %86, %80 : vector<8x128xf32>
      %c0_47 = arith.constant 0 : index
      %c0_48 = arith.constant 0 : index
      %88 = vector.load %arg17[%c0_47, %c0_48] : memref<8x128xf32, #tpu.memory_space<vmem>>, vector<8x128xf32>
      tpu.vector_store %arg17[%c0_47, %c0_48], %87 {strides = array<i32>} : memref<8x128xf32, #tpu.memory_space<vmem>>, vector<8x128xf32>,
      %c0_49 = arith.constant 0 : index
      %c0_50 = arith.constant 0 : index
      %89 = vector.load %arg5[%c0_49, %c0_50] : memref<2x8xf32, #tpu.memory_space<vmem>>, vector<2x8xf32>
      %cst_51 = arith.constant dense<0.000000e+00> : vector<2x128xf32>
      %90 = tpu.matmul %89, %87, %cst_51 {dimension_numbers = #tpu.dot_dimension_numbers<[1], [0], [0], [1], [0, 0, 1, 1], [], []>} : vector<2x8xf32>, vector<8x128xf32>, vector<2x128xf32> -> vector<2x128xf32>
      %c0_52 = arith.constant 0 : index
      %c0_53 = arith.constant 0 : index
      %91 = vector.load %arg18[%c0_52, %c0_53] : memref<2x128xf32, #tpu.memory_space<vmem>>, vector<2x128xf32>
      tpu.vector_store %arg18[%c0_52, %c0_53], %90 {strides = array<i32>} : memref<2x128xf32, #tpu.memory_space<vmem>>, vector<2x128xf32>,
      %c0_54 = arith.constant 0 : index
      %c0_55 = arith.constant 0 : index
      %92 = vector.load %arg13[%c0_54, %c0_55] : memref<128x128xf32, #tpu.memory_space<vmem>>, vector<128x128xf32>
      %cst_56 = arith.constant dense<0.000000e+00> : vector<2x128xf32>
      %93 = tpu.matmul %90, %92, %cst_56 {dimension_numbers = #tpu.dot_dimension_numbers<[1], [0], [0], [1], [0, 0, 1, 1], [], []>} : vector<2x128xf32>, vector<128x128xf32>, vector<2x128xf32> -> vector<2x128xf32>
      %c0_57 = arith.constant 0 : index
      %c0_58 = arith.constant 0 : index
      %94 = vector.load %arg14[%c0_57, %c0_58] : memref<1x128xf32, #tpu.memory_space<vmem>>, vector<1x128xf32>
      %95 = vector.broadcast %94 : vector<1x128xf32> to vector<2x128xf32>
      %96 = arith.addf %93, %95 : vector<2x128xf32>
      %cst_59 = arith.constant 0.000000e+00 : f32
      %97 = vector.broadcast %cst_59 : f32 to vector<2x128xf32>
      %98 = arith.maximumf %96, %97 : vector<2x128xf32>
      %c0_60 = arith.constant 0 : index
      %c0_61 = arith.constant 0 : index
      %99 = vector.load %arg15[%c0_60, %c0_61] : memref<128x128xf32, #tpu.memory_space<vmem>>, vector<128x128xf32>
      %cst_62 = arith.constant dense<0.000000e+00> : vector<2x128xf32>
      %100 = tpu.matmul %98, %99, %cst_62 {dimension_numbers = #tpu.dot_dimension_numbers<[1], [0], [0], [1], [0, 0, 1, 1], [], []>} : vector<2x128xf32>, vector<128x128xf32>, vector<2x128xf32> -> vector<2x128xf32>
      %c0_63 = arith.constant 0 : index
      %c0_64 = arith.constant 0 : index
      %101 = vector.load %arg16[%c0_63, %c0_64] : memref<1x128xf32, #tpu.memory_space<vmem>>, vector<1x128xf32>
      %102 = vector.broadcast %101 : vector<1x128xf32> to vector<2x128xf32>
      %103 = arith.addf %100, %102 : vector<2x128xf32>
      %c0_65 = arith.constant 0 : index
      %c0_66 = arith.constant 0 : index
      %104 = vector.load %arg19[%c0_65, %c0_66] : memref<2x128xf32, #tpu.memory_space<vmem>>, vector<2x128xf32>
      tpu.vector_store %arg19[%c0_65, %c0_66], %103 {strides = array<i32>} : memref<2x128xf32, #tpu.memory_space<vmem>>, vector<2x128xf32>,
    } else {
    }
    return
  }
  func.func @transform_0(%arg0: i32) -> (i32, i32) {
    %c0_i32 = arith.constant 0 : i32
    %c0_i32_0 = arith.constant 0 : i32
    %c0_i32_1 = arith.constant 0 : i32
    return %c0_i32, %c0_i32_0 : i32, i32
  }
  func.func @transform_1(%arg0: i32) -> (i32, i32) {
    %c0_i32 = arith.constant 0 : i32
    %c0_i32_0 = arith.constant 0 : i32
    return %arg0, %c0_i32 : i32, i32
  }
  func.func @transform_2(%arg0: i32) -> (i32, i32) {
    %c0_i32 = arith.constant 0 : i32
    %c0_i32_0 = arith.constant 0 : i32
    return %arg0, %c0_i32 : i32, i32
  }
  func.func @transform_3(%arg0: i32) -> (i32, i32) {
    %c0_i32 = arith.constant 0 : i32
    %c0_i32_0 = arith.constant 0 : i32
    return %arg0, %c0_i32 : i32, i32
  }
  func.func @transform_4(%arg0: i32) -> (i32, i32) {
    %c0_i32 = arith.constant 0 : i32
    %c0_i32_0 = arith.constant 0 : i32
    %c0_i32_1 = arith.constant 0 : i32
    return %c0_i32, %c0_i32_0 : i32, i32
  }
  func.func @transform_5(%arg0: i32) -> (i32, i32) {
    %c0_i32 = arith.constant 0 : i32
    %c0_i32_0 = arith.constant 0 : i32
    %c0_i32_1 = arith.constant 0 : i32
    return %c0_i32, %c0_i32_0 : i32, i32
  }
  func.func @transform_6(%arg0: i32) -> (i32, i32) {
    %c0_i32 = arith.constant 0 : i32
    %c0_i32_0 = arith.constant 0 : i32
    %c0_i32_1 = arith.constant 0 : i32
    return %c0_i32, %c0_i32_0 : i32, i32
  }
  func.func @transform_7(%arg0: i32) -> (i32, i32) {
    %c0_i32 = arith.constant 0 : i32
    %c0_i32_0 = arith.constant 0 : i32
    %c0_i32_1 = arith.constant 0 : i32
    return %c0_i32, %c0_i32_0 : i32, i32
  }
  func.func @transform_8(%arg0: i32) -> (i32, i32) {
    %c0_i32 = arith.constant 0 : i32
    %c0_i32_0 = arith.constant 0 : i32
    %c0_i32_1 = arith.constant 0 : i32
    return %c0_i32, %c0_i32_0 : i32, i32
  }
  func.func @transform_9(%arg0: i32) -> (i32, i32) {
    %c0_i32 = arith.constant 0 : i32
    %c0_i32_0 = arith.constant 0 : i32
    %c0_i32_1 = arith.constant 0 : i32
    return %c0_i32, %c0_i32_0 : i32, i32
  }
  func.func @transform_10(%arg0: i32) -> (i32, i32) {
    %c0_i32 = arith.constant 0 : i32
    %c0_i32_0 = arith.constant 0 : i32
    %c0_i32_1 = arith.constant 0 : i32
    return %c0_i32, %c0_i32_0 : i32, i32
  }
  func.func @transform_11(%arg0: i32) -> (i32, i32) {
    %c0_i32 = arith.constant 0 : i32
    %c0_i32_0 = arith.constant 0 : i32
    %c0_i32_1 = arith.constant 0 : i32
    return %c0_i32, %c0_i32_0 : i32, i32
  }
  func.func @transform_12(%arg0: i32) -> (i32, i32) {
    %c0_i32 = arith.constant 0 : i32
    %c0_i32_0 = arith.constant 0 : i32
    %c0_i32_1 = arith.constant 0 : i32
    return %c0_i32, %c0_i32_0 : i32, i32
  }
  func.func @transform_13(%arg0: i32) -> (i32, i32) {
    %c0_i32 = arith.constant 0 : i32
    %c0_i32_0 = arith.constant 0 : i32
    %c0_i32_1 = arith.constant 0 : i32
    return %c0_i32, %c0_i32_0 : i32, i32
  }
  func.func @transform_14(%arg0: i32) -> (i32, i32) {
    %c0_i32 = arith.constant 0 : i32
    %c0_i32_0 = arith.constant 0 : i32
    %c0_i32_1 = arith.constant 0 : i32
    return %c0_i32, %c0_i32_0 : i32, i32
  }
  func.func @transform_15(%arg0: i32) -> (i32, i32) {
    %c0_i32 = arith.constant 0 : i32
    %c0_i32_0 = arith.constant 0 : i32
    %c0_i32_1 = arith.constant 0 : i32
    return %c0_i32, %c0_i32_0 : i32, i32
  }
  func.func @transform_16(%arg0: i32) -> (i32, i32) {
    %c0_i32 = arith.constant 0 : i32
    %c0_i32_0 = arith.constant 0 : i32
    %c0_i32_1 = arith.constant 0 : i32
    return %c0_i32, %c0_i32_0 : i32, i32
  }
  func.func @transform_17(%arg0: i32) -> (i32, i32) {
    %c0_i32 = arith.constant 0 : i32
    %c0_i32_0 = arith.constant 0 : i32
    %c0_i32_1 = arith.constant 0 : i32
    return %c0_i32, %c0_i32_0 : i32, i32
  }
  func.func @transform_18(%arg0: i32) -> (i32, i32) {
    %c0_i32 = arith.constant 0 : i32
    %c0_i32_0 = arith.constant 0 : i32
    %c0_i32_1 = arith.constant 0 : i32
    return %c0_i32, %c0_i32_0 : i32, i32
  }
}

</mosaic_0001>

<bundles_post_ra>
// kernel: tpu_custom_call.1
= control target key start
LH: loop header
LB: loop body
LE: loop exit
PB: predicated region body
PF: predicated region fallthrough
CT: control target
= control target key end

     0   :  { %s2488_s0 = inlined_call_operand.vmem [shape: f32[8,4], index: 0, kind: input, shape index: {}]   ;;  %s2489_s1 = inlined_call_operand.vmem [shape: f32[24,6], index: 1, kind: input, shape index: {}]   ;;  %s2490_s2 = inlined_call_operand.vmem [shape: bf16[24,8], index: 2, kind: input, shape index: {}]   ;;  %s2491_s3 = inlined_call_operand.vmem [shape: bf16[24,8], index: 3, kind: input, shape index: {}]   ;;  %s2492_s4 = inlined_call_operand.vmem [shape: f32[2,8], index: 4, kind: input, shape index: {}]   ;;  %s2493_s5 = inlined_call_operand.vmem [shape: f32[4,128], index: 5, kind: input, shape index: {}]   ;;  %s2494_s6 = inlined_call_operand.vmem [shape: f32[4,128], index: 6, kind: input, shape index: {}]   ;;  %s2495_s7 = inlined_call_operand.vmem [shape: f32[6,128], index: 7, kind: input, shape index: {}]   ;;  %s2496_s8 = inlined_call_operand.vmem [shape: f32[1,128], index: 8, kind: input, shape index: {}]   ;;  %s2497_s9 = inlined_call_operand.hbm [shape: f32[128,128], index: 9, kind: input, shape index: {}]   ;;  %s2498_s10 = inlined_call_operand.vmem [shape: f32[1,128], index: 10, kind: input, shape index: {}]   ;;  %s2499_s11 = inlined_call_operand.vmem [shape: f32[1,128], index: 11, kind: input, shape index: {}]   ;;  %s2500_s12 = inlined_call_operand.hbm [shape: f32[128,128], index: 12, kind: input, shape index: {}]   ;;  %s2501_s13 = inlined_call_operand.vmem [shape: f32[1,128], index: 13, kind: input, shape index: {}]   ;;  %s2502_s14 = inlined_call_operand.hbm [shape: f32[128,128], index: 14, kind: input, shape index: {}]   ;;  %s2503_s15 = inlined_call_operand.vmem [shape: f32[1,128], index: 15, kind: input, shape index: {}]   ;;  %s2504_s16 = inlined_call_operand.hbm [shape: f32[8,128], index: 16, kind: output, shape index: {0}]   ;;  %s2505_s17 = inlined_call_operand.hbm [shape: f32[2,128], index: 17, kind: output, shape index: {1}]   ;;  %s2506_s18 = inlined_call_operand.hbm [shape: f32[2,128], index: 18, kind: output, shape index: {2}]  }
   0x1   :  { %2507 = sst [smem:[#allocation19_spill]] %s2488_s0 }
   0x2   :  { %2508 = sst [smem:[#allocation20_spill]] %s2489_s1 }
   0x3   :  { %2509 = sst [smem:[#allocation21_spill]] %s2490_s2 }
   0x4   :  { %2510 = sst [smem:[#allocation22_spill]] %s2497_s9 }
   0x5   :  { %2511 = sst [smem:[#allocation23_spill]] %s2500_s12 }
   0x6   :  { %2512 = sst [smem:[#allocation24_spill]] %s2502_s14 }
   0x7   :  { %24 = vsyncpa [#allocation6], 0 }
   0x8   :  { %25 = vsyncpa [#allocation9], 0 }
   0x9   :  { %26 = vsyncpa [#allocation7], 0 }
   0xa   :  { %27 = vsyncpa [#allocation13], 0  ;;  %s2256_s27 = smov 0  }
   0xb LB: > { %s2262_s28 = sadd.s32 4294967295, %s2143_s27   ;;  %p1657_p0 = scmp.ge.s32.totalorder %s2143_s27, 1  ;;  %s2143_s27 = sphi %s2256_s27, %s33_s27  }
   0xc   : > { %p452_p1 = scmp.lt.s32.totalorder %s2143_s27, 4  ;;  %p1927_p3 = scmp.eq.s32.totalorder %s2262_s28, 0 }
   0xd   : > { %s2145_s30 = smov [#allocation8]   ;;  %s2146_s19 = smov [#allocation5]  }
   0xe   : > { %p2268_p4 = pnand %p1657_p0, %p452_p1  ;;  %s501_s0 = sshll.u32 %s2145_s30, 4  ;;  %s502_s0 = int_to_ptr.vmem [resolvable:$true] %s501_s0 }
   0xf   : > { %s482_s1 = sshll.u32 %s2146_s19, 4  ;;  %s2147_s21 = smov [#allocation10]   ;;  %s483_s1 = int_to_ptr.vmem [resolvable:$true] %s482_s1 }
  0x10   : > { %p1917_p5 = pneg %p2268_p4  ;;  %s517_s22 = sshll.u32 %s2147_s21, 4  ;;  %s2280_s22 = int_to_ptr.vmem [resolvable:$true] %s517_s22 }
  0x11   : > { %s1982_s2 = scalar_lea.vmem %s502_s0, 2048  ;;  %p1990_p11 = scmp.lt.s32.totalorder %s502_s0, %s502_s0 }
  0x12   : > { %p2276_p6 = pnand %p1927_p3, %p1917_p5  ;;  %p1983_p8 = scmp.ne.s32.totalorder %s502_s0, %s1982_s2 }
  0x13   : > { %p1991_p12 = scmp.lt.s32.totalorder %s1982_s2, %s1982_s2 }
  0x14   : > { %p1973_p7 = pneg %p2276_p6 }
  0x15   : > { %p1992_p13 = por %p1991_p12, %p1990_p11 }
  0x16   : > { %p1985_p9 = pnand %p1983_p8, %p1973_p7 }
  0x18   : > { %p1986_p10 = pneg %p1985_p9 }
  0x1a   : > { %p1993_p0 = pnand %p1992_p13, %p1986_p10 }
  0x1c   : > { %1996 = shalt.err (!%p1993_p0)
}
  0x1d   : > { %s2148_s23 = smov 128   ;;  %s2149_s24 = smov 8  }
  0x1e   : > { %s2515_s12 = sld [smem:[#allocation23_spill]]  ;;  %s2008_s30 = scalar_lea.vmem %s483_s1, 2048 }
  0x1f   : > { %p2009_p1 = scmp.ne.s32.totalorder %s483_s1, %s2008_s30  ;;  %p2016_p9 = scmp.lt.s32.totalorder %s483_s1, %s483_s1 }
  0x20   : > { %p2017_p2 = scmp.lt.s32.totalorder %s2008_s30, %s2008_s30 }
  0x21   : > { %p2011_p5 = pnand %p2009_p1, %p1973_p7 }
  0x22   : > { %p2018_p11 = por %p2017_p2, %p2016_p9 }
  0x23   : > { %p2012_p8 = pneg %p2011_p5 }
  0x24   : > { %1923 = dma.hbm_to_vmem [thread:$0]  (!%p2276_p6), %s2515_s12, 2048, %s502_s0, [#allocation9], %s2148_s23, %s2148_s23, %s2149_s24  }
  0x25   : > { %p2019_p10 = pnand %p2018_p11, %p2012_p8 }
  0x27   : > { %2022 = shalt.err (!%p2019_p10)
}
  0x28   : > { %s2516_s9 = sld [smem:[#allocation22_spill]]  ;;  %s2034_s0 = scalar_lea.vmem %s2280_s22, 2048 }
  0x29   : > { %p2035_p12 = scmp.ne.s32.totalorder %s2280_s22, %s2034_s0  ;;  %p2042_p2 = scmp.lt.s32.totalorder %s2280_s22, %s2280_s22 }
  0x2a   : > { %p2043_p1 = scmp.lt.s32.totalorder %s2034_s0, %s2034_s0 }
  0x2b   : > { %p2037_p13 = pnand %p2035_p12, %p1973_p7 }
  0x2c   : > { %p2044_p5 = por %p2043_p1, %p2042_p2 }
  0x2d   : > { %p2038_p0 = pneg %p2037_p13 }
  0x2e   : > { %1920 = dma.hbm_to_vmem [thread:$0]  (!%p2276_p6), %s2516_s9, 2048, %s483_s1, [#allocation6], %s2148_s23, %s2148_s23, %s2149_s24  }
  0x2f   : > { %p2045_p8 = pnand %p2044_p5, %p2038_p0 }
  0x31   : > { %2048 = shalt.err (!%p2045_p8)
}
  0x32   : > { %s2517_s14 = sld [smem:[#allocation24_spill]] }
  0x34   : > { %557 = sbr.rel (%p2268_p4) target bundleno = 1990 (0x7c6), region = 84 }
  0x38   : > { %1926 = dma.hbm_to_vmem [thread:$0]  (!%p2276_p6), %s2517_s14, 2048, %s2280_s22, [#allocation9], %s2148_s23, %s2148_s23, %s2149_s24  }
  0x39   : > { %2126 = dma.done.wait (%p1927_p3), [#allocation6], 2048  }
  0x3a   : > { %2128 = vsyncadd (%p1927_p3), [#allocation6], 4294965248 }
  0x3b   : > { %2130 = dma.done.wait (%p1927_p3), [#allocation9], 4096  }
  0x3c   : > { %2132 = vsyncadd (%p1927_p3), [#allocation9], 4294963200  ;;  %p621_p7 = scmp.lt.s32.totalorder %s2262_s28, 2  ;;  %s2518_s24 = sld [smem:[#allocation20_spill]] }
  0x3d   : > { %s2519_s21 = sld [smem:[#allocation21_spill]]  ;;  %p2520_p3 = scmp.ne.s32.totalorder %s2262_s28, 0 }
  0x3e   : > { %s622_s1 = scalar_select %p621_p7, %s2262_s28, 2 }
  0x3f   : > { %636 = sbr.rel (%p2520_p3) target bundleno = 266 (0x10a), region = 100  ;;  %s2521_s29 = sld [smem:[#allocation19_spill]] (!%p2520_p3) }
  0x40   : > { %s1666_s20 = sshll.u32 %s622_s1, 3  ;;  %s1667_s22 = sshll.u32 %s622_s1, 2 }
  0x41   : > { %s2336_s9 = scalar_lea.vmem %s2491_s3, %s1667_s22 }
  0x42   : > { %s624_s26 = scalar_lea.vmem %s2518_s24, %s1666_s20 }
  0x43   : > { %s2331_s0 = scalar_lea.vmem %s2519_s21, %s1667_s22 }
  0x44   : > { %v638_v0 = vld [vmem:[%s2493_s5] sm:$0xf]  ;;  %vm643_vm0 = vcmask 1043456   ;;  %v2150_v2 = vmov 0.0   ;;  %vm2151_vm1 = vmmov 0   ;;  %vm639_vm2 = vcmask 31744  }
  0x45   : > { %v637_v1 = vld [vmem:[%s2521_s29] sm:$0xff]  ;;  %1758 = vmatprep.subr.mxu0 %v2150_v2  ;;  %718 = vst [vmem:[#allocation3] sm:$0xff] %v2150_v2  ;;  %1760 = vmatprep.mubr.msk.f32.mxu0 %vm2151_vm1, %v2150_v2  ;;  %vm719_vm3 = vcmask 0   ;;  %v2152_v3 = vmov -1e+30  }
  0x46   : > { %1759 = vmatpush3.msk.msra.mxu0 %vm643_vm0, %v638_v0  ;;  %720 = vst.msk [vmem:[#allocation4] sm:$0x1] %vm719_vm3, %v2152_v3 }
  0x47   : > { %1761 = vmatmul.mubr.msk.f32.vlgmr.msra.gmra.mxu0 %vm639_vm2, %v637_v1 }
 0x107   : > { %v713_v4 = vpop.f32.mrf.mxu0 }
 0x108   : > { %717 = vst [vmem:[#allocation2] sm:$0xff] %v713_v4 }
 0x109   : > { %v1762_v5 = vpop.f32.mrf.mxu0 }
 0x10a PF: > { %v726_v6 = vld [vmem:[%s2495_s7] sm:$0x3f]  ;;  %vm738_vm4 = vcmask 1045504   ;;  %v2153_v8 = vmov 0.0   ;;  %vm2154_vm5 = vmmov 0   ;;  %vm734_vm6 = vcmask 48128  }
 0x10b   : > { %v725_v7 = vld [vmem:[%s624_s26] sm:$0xff]  ;;  %1763 = vmatprep.subr.mxu0 %v2153_v8  ;;  %1765 = vmatprep.mubr.msk.f32.mxu0 %vm2154_vm5, %v2153_v8  ;;  %v828_v9 = vld [vmem:[#allocation5 + $0x78] sm:$0xff]  ;;  %v825_v12 = vld [vmem:[#allocation5 + $0x60] sm:$0xff]  ;;  %vm907_vm7 = vcmask 64512   ;;  %v995_v35 = vlaneseq  ;;  %v2155_v48 = vmov 0   ;;  %s1678_s21 = sshll.u32 %s2262_s28, 3 }
 0x10c   : > { %1764 = vmatpush3.msk.msra.mxu0 %vm738_vm4, %v726_v6  ;;  %1768 = vmatprep.subr.mxu1 %v2153_v8  ;;  %v827_v10 = vld [vmem:[#allocation5 + $0x70] sm:$0xff]  ;;  %v826_v11 = vld [vmem:[#allocation5 + $0x68] sm:$0xff]  ;;  %v824_v13 = vld [vmem:[#allocation5 + $0x58] sm:$0xff]  ;;  %v997_v50 = vstv %s1678_s21  ;;  %vm1151_vm11 = vcmask 0   ;;  %p1681_p4 = scmp.ne.s32.totalorder %s2262_s28, 2 }
 0x10d   : > { %1766 = vmatmul.mubr.msk.f32.vlgmr.msra.gmra.mxu0 %vm734_vm6, %v725_v7  ;;  %1769 = vmatpush3.msra.mxu1 %v828_v9  ;;  %v823_v14 = vld [vmem:[#allocation5 + $0x50] sm:$0xff]  ;;  %v822_v15 = vld [vmem:[#allocation5 + $0x48] sm:$0xff]  ;;  %v821_v16 = vld [vmem:[#allocation5 + $0x40] sm:$0xff]  ;;  %v1022_v36 = vand.u32 127, %v995_v35  ;;  %v996_v49 = vshrl.u32 %v995_v35, 7  ;;  %s2522_s1 = sld [smem:[#allocation19_spill]] (!%p1681_p4) }
 0x10e   : > { %1770 = vmatprep.subr.mxu1 %v2153_v8  ;;  %1803 = vmatprep.subr.mxu0 %v2153_v8  ;;  %v820_v17 = vld [vmem:[#allocation5 + $0x38] sm:$0xff]  ;;  %v819_v18 = vld [vmem:[#allocation5 + $0x30] sm:$0xff]  ;;  %v818_v19 = vld [vmem:[#allocation5 + $0x28] sm:$0xff] }
 0x10f   : > { %1771 = vmatpush3.msra.mxu1 %v827_v10  ;;  %1800 = vmatprep.mubr.msk.f32.mxu1 %vm2154_vm5, %v2153_v8  ;;  %v817_v20 = vld [vmem:[#allocation5 + $0x20] sm:$0xff]  ;;  %v816_v21 = vld [vmem:[#allocation5 + $0x18] sm:$0xff]  ;;  %v815_v22 = vld [vmem:[#allocation5 + $0x10] sm:$0xff]  ;;  %vm1023_vm8 = vcmp.eq.s32.totalorder %v1022_v36, 127  ;;  %v998_v51 = vadd.s32 %v997_v50, %v996_v49  ;;  %v1015_v62 = vsub.s32 0, %v996_v49 }
 0x110   : > { %1772 = vmatprep.subr.mxu1 %v2153_v8  ;;  %1805 = vmatprep.mubr.msk.f32.mxu0 %vm2154_vm5, %v2153_v8  ;;  %v814_v23 = vld [vmem:[#allocation5 + $0x8] sm:$0xff]  ;;  %v813_v25 = vld [vmem:[#allocation5] sm:$0xff]  ;;  %v2388_v42 = vsel %vm1023_vm8, 1.0, %v2153_v8  ;;  %v1001_v61 = vld [vmem:[#allocation4] sm:$0x1] }
 0x111   : > { %1773 = vmatpush3.msra.mxu1 %v826_v11  ;;  %v721_v24 = vld [vmem:[%s2331_s0] sm:$0xf]  ;;  %1963 = vset.pattern.permute.xlu0 %v2155_v48  ;;  %vm999_vm9 = vcmp.lt.s32.totalorder %v998_v51, 20 }
 0x112   : > { %1774 = vmatprep.subr.mxu1 %v2153_v8  ;;  %v906_v26 = vld [vmem:[#allocation2] sm:$0xff]  ;;  %v722_v27 = vunpack.c.l.bf16 %v721_v24 }
 0x113   : > { %1775 = vmatpush3.msra.mxu1 %v825_v12  ;;  %1804 = vmatpush3.msra.mxu0 %v906_v26  ;;  %v1672_v28 = vld [vmem:[%s2496_s8] ss:$0 sm:$0xff]  ;;  %v1138_v12 = vld [vmem:[#allocation3] sm:$0xff] }
 0x114   : > { %1776 = vmatprep.subr.mxu1 %v2153_v8  ;;  %1806 = vmatmul.mubr.msk.f32.vlgmr.msra.gmra.mxu0 %vm907_vm7, %v722_v27  ;;  %v1675_v37 = vld [vmem:[%s2498_s10] ss:$0 sm:$0xff] }
 0x115   : > { %1777 = vmatpush3.msra.mxu1 %v824_v13  ;;  %1808 = vmatprep.subr.mxu0 %v2153_v8  ;;  %v1677_v41 = vld [vmem:[%s2499_s11] ss:$0 sm:$0xff] }
 0x116   : > { %1778 = vmatprep.subr.mxu1 %v2153_v8  ;;  %1810 = vmatprep.mubr.msk.f32.mxu0 %vm2154_vm5, %v2153_v8  ;;  %v723_v46 = vld [vmem:[%s2336_s9] sm:$0xf] }
 0x117   : > { %1779 = vmatpush3.msra.mxu1 %v823_v14  ;;  %v724_v47 = vunpack.c.l.bf16 %v723_v46 }
 0x118   : > { %1780 = vmatprep.subr.mxu1 %v2153_v8 }
 0x119   : > { %1781 = vmatpush3.msra.mxu1 %v822_v15  ;;  %1033 = vxpose.xlu1.b32.start.end [1/1] (short) (narrow) %v724_v47, 8 }
 0x11a   : > { %1782 = vmatprep.subr.mxu1 %v2153_v8 }
 0x11b   : > { %1783 = vmatpush3.msra.mxu1 %v821_v16 }
 0x11c   : > { %1784 = vmatprep.subr.mxu1 %v2153_v8 }
 0x11d   : > { %1785 = vmatpush3.msra.mxu1 %v820_v17 }
 0x11e   : > { %1786 = vmatprep.subr.mxu1 %v2153_v8 }
 0x11f   : > { %1787 = vmatpush3.msra.mxu1 %v819_v18 }
 0x120   : > { %1788 = vmatprep.subr.mxu1 %v2153_v8 }
 0x121   : > { %1789 = vmatpush3.msra.mxu1 %v818_v19 }
 0x122   : > { %1790 = vmatprep.subr.mxu1 %v2153_v8 }
 0x123   : > { %1791 = vmatpush3.msra.mxu1 %v817_v20 }
 0x124   : > { %1792 = vmatprep.subr.mxu1 %v2153_v8 }
 0x125   : > { %1793 = vmatpush3.msra.mxu1 %v816_v21 }
 0x126   : > { %1794 = vmatprep.subr.mxu1 %v2153_v8 }
 0x127   : > { %1795 = vmatpush3.msra.mxu1 %v815_v22 }
 0x128   : > { %1796 = vmatprep.subr.mxu1 %v2153_v8 }
 0x129   : > { %1797 = vmatpush3.msra.mxu1 %v814_v23 }
 0x12a   : > { %1798 = vmatprep.subr.mxu1 %v2153_v8 }
 0x12b   : > { %1799 = vmatpush3.msra.mxu1 %v813_v25 }
 0x137   : > { %1964 = vset.pattern.permute.xlu1 %v2155_v48 }
 0x195   : > { %v1049_v11 = vpop.trf.xlu1 }
 0x1cd   : > { %v808_v29 = vpop.f32.mrf.mxu0 }
 0x1ce   : > { %v809_v30 = vadd.f32 %v1672_v28, %v808_v29 }
 0x1cf   : > { %v1767_v31 = vpop.f32.mrf.mxu0 }
 0x1d0   : > { %v812_v32 = vmax.f32 %v809_v30, 0.0 }
 0x1d2   : > { %1801 = vmatmul.mubr.f32.vlgmr.msra.gmra.mxu1 %v812_v32 }
 0x1d4   : > { %v977_v33 = vpop.f32.mrf.mxu0 }
 0x1d6   : > { %v1807_v34 = vpop.f32.mrf.mxu0 }
 0x292   : > { %v902_v38 = vpop.f32.mrf.mxu1 }
 0x293   : > { %v903_v39 = vadd.f32 %v1675_v37, %v902_v38 }
 0x294   : > { %v1802_v40 = vpop.f32.mrf.mxu1 }
 0x295   : > { %v978_v43 = vadd.f32 %v977_v33, %v903_v39 }
 0x297   : > { %v988_v44 = vmul.f32 %v1677_v41, %v978_v43  ;;  %v1026_v45 = vadd.f32 %v2388_v42, %v978_v43 }
 0x299   : > { %989 = vadd.xlane.f32.xlu0 %v988_v44 }
 0x322   : > { %v990_v52 = vpop.xlane.xlu0 %989 }
 0x323   : > { %vm991_vm10 = vcmp.gt.f32.partialorder %v990_v52, 0.0  ;;  %v992_v53 = vmul.f32 0.2, %v990_v52 }
 0x325   : > { %v993_v54 = vsel %vm991_vm10, %v990_v52, %v992_v53 }
 0x326   : > { %v1000_v55 = vsel %vm999_vm9, %v993_v54, -1e+30 }
 0x327   : > { %v1002_v56 = vrot.slane %v1000_v55, 4 }
 0x329   : > { %v1003_v57 = vmax.f32 %v1000_v55, %v1002_v56 }
 0x32b   : > { %v1004_v58 = vrot.slane %v1003_v57, 2 }
 0x32d   : > { %v1005_v59 = vmax.f32 %v1003_v57, %v1004_v58 }
 0x32f   : > { %v1006_v60 = vrot.slane %v1005_v59, 1 }
 0x331   : > { %v1007_v63 = vmax.f32 %v1005_v59, %v1006_v60 }
 0x333   : > { %v1008_v0 = vmax.f32 %v1001_v61, %v1007_v63 }
 0x335   : > { %v1009_v1 = vsub.f32 %v1001_v61, %v1008_v0  ;;  %v1016_v2 = vrot.slane %v1008_v0, %v1015_v62  ;;  %1152 = vst.msk [vmem:[#allocation4] sm:$0x1] %vm1151_vm11, %v1008_v0 }
 0x337   : > { %v1010_v3 = vmul.f32 1.442695, %v1009_v1  ;;  %v1018_v4 = vsub.f32 %v1000_v55, %v1016_v2 }
 0x339   : > { %v1019_v5 = vmul.f32 1.442695, %v1018_v4  ;;  %1965 = vpow2.f32 %v1010_v3 }
 0x33b   : > { %1967 = vpow2.f32 %v1019_v5 }
 0x346   : > { %v1966_v6 = vpop.eup %1965 }
 0x347   : > { %v1143_v7 = vrot.slane %v1966_v6, %v1015_v62 }
 0x348   : > { %v1968_v8 = vpop.eup %1967 }
 0x349   : > { %1029 = vperm.xlu0 %1963, %v1968_v8   ;;  %1145 = vperm.xlu1 %1964, %v1143_v7  }
 0x3c4   : > { %v1030_v9 = vpop.permute.xlu0 %1029  ;;  %v1146_v13 = vpop.permute.xlu1 %1145 }
 0x3c5   : > { %v1032_v10 = vmul.f32 %v1030_v9, %v1026_v45  ;;  %v1148_v14 = vmul.f32 %v1146_v13, %v1138_v12 }
 0x3c7   : > { %1809 = vmatpush3.msra.mxu0 %v1032_v10 }
 0x3c8   : > { %1811 = vmatmul.mubr.msk.f32.vlgmr.msra.gmra.mxu0 %vm907_vm7, %v1049_v11 }
 0x487   : > { %1156 = sbr.rel (%p1681_p4) target bundleno = 1949 (0x79d), region = 104 }
 0x488   : > { %v1134_v15 = vpop.f32.mrf.mxu0 }
 0x489   : > { %v1149_v16 = vadd.f32 %v1148_v14, %v1134_v15 }
 0x48a   : > { %v1812_v17 = vpop.f32.mrf.mxu0 }
 0x48b   : > { %1150 = vst [vmem:[#allocation3] sm:$0xff] %v1149_v16 }
 0x48c   : > { %v1165_v18 = vld [vmem:[%s2494_s6] sm:$0xf]  ;;  %vm1170_vm12 = vcmask 1043456   ;;  %v2156_v20 = vmov 0.0   ;;  %vm2157_vm13 = vmmov 0   ;;  %vm1166_vm14 = vcmask 31744  }
 0x48d   : > { %v1164_v19 = vld [vmem:[%s2522_s1] sm:$0xff]  ;;  %1813 = vmatprep.subr.mxu0 %v2156_v20  ;;  %1815 = vmatprep.mubr.msk.f32.mxu0 %vm2157_vm13, %v2156_v20  ;;  %v1339_v23 = vld [vmem:[#allocation8 + $0x78] sm:$0xff]  ;;  %v1336_v26 = vld [vmem:[#allocation8 + $0x60] sm:$0xff]  ;;  %v1245_v43 = vsub.f32 1.0, %v2388_v42 }
 0x48e   : > { %1814 = vmatpush3.msk.msra.mxu0 %vm1170_vm12, %v1165_v18  ;;  %1818 = vmatprep.subr.mxu1 %v2156_v20  ;;  %v1338_v24 = vld [vmem:[#allocation8 + $0x70] sm:$0xff]  ;;  %v1337_v25 = vld [vmem:[#allocation8 + $0x68] sm:$0xff]  ;;  %v1335_v27 = vld [vmem:[#allocation8 + $0x58] sm:$0xff] }
 0x48f   : > { %1816 = vmatmul.mubr.msk.f32.vlgmr.msra.gmra.mxu0 %vm1166_vm14, %v1164_v19  ;;  %1820 = vmatprep.mubr.msk.f32.mxu1 %vm2157_vm13, %v2156_v20  ;;  %v1334_v28 = vld [vmem:[#allocation8 + $0x50] sm:$0xff]  ;;  %v1333_v29 = vld [vmem:[#allocation8 + $0x48] sm:$0xff]  ;;  %v1332_v30 = vld [vmem:[#allocation8 + $0x40] sm:$0xff] }
 0x490   : > { %1823 = vmatprep.subr.mxu0 %v2156_v20  ;;  %1855 = vmatprep.mubr.msk.f32.mxu0 %vm2157_vm13, %v2156_v20  ;;  %v1331_v31 = vld [vmem:[#allocation8 + $0x38] sm:$0xff]  ;;  %v1330_v32 = vld [vmem:[#allocation8 + $0x30] sm:$0xff]  ;;  %v1329_v33 = vld [vmem:[#allocation8 + $0x28] sm:$0xff] }
 0x491   : > { %1824 = vmatpush3.msra.mxu0 %v1339_v23  ;;  %v1328_v34 = vld [vmem:[#allocation8 + $0x20] sm:$0xff]  ;;  %v1327_v35 = vld [vmem:[#allocation8 + $0x18] sm:$0xff]  ;;  %v1326_v36 = vld [vmem:[#allocation8 + $0x10] sm:$0xff] }
 0x492   : > { %v1157_v21 = vld [vmem:[#allocation3] sm:$0xff]  ;;  %1825 = vmatprep.subr.mxu0 %v2156_v20  ;;  %v1325_v37 = vld [vmem:[#allocation8 + $0x8] sm:$0xff]  ;;  %v1324_v49 = vld [vmem:[#allocation8] sm:$0xff] }
 0x493   : > { %v1158_v22 = vmul.f32 %v2388_v42, %v1157_v21  ;;  %1826 = vmatpush3.msra.mxu0 %v1338_v24  ;;  %v1249_v47 = vld [vmem:[%s2492_s4] sm:$0x3]  ;;  %v1433_v42 = vld [vmem:[#allocation10 + $0x78] sm:$0xff]  ;;  %v1430_v52 = vld [vmem:[#allocation10 + $0x60] sm:$0xff] }
 0x494   : > { %1827 = vmatprep.subr.mxu0 %v2156_v20  ;;  %v1432_v50 = vld [vmem:[#allocation10 + $0x70] sm:$0xff]  ;;  %v1431_v51 = vld [vmem:[#allocation10 + $0x68] sm:$0xff]  ;;  %v1429_v53 = vld [vmem:[#allocation10 + $0x58] sm:$0xff] }
 0x495   : > { %1159 = vadd.xlane.f32.xlu0 %v1158_v22  ;;  %1828 = vmatpush3.msra.mxu0 %v1337_v25  ;;  %v1428_v54 = vld [vmem:[#allocation10 + $0x50] sm:$0xff]  ;;  %v1427_v55 = vld [vmem:[#allocation10 + $0x48] sm:$0xff]  ;;  %v1426_v56 = vld [vmem:[#allocation10 + $0x40] sm:$0xff] }
 0x496   : > { %1829 = vmatprep.subr.mxu0 %v2156_v20  ;;  %v1425_v57 = vld [vmem:[#allocation10 + $0x38] sm:$0xff]  ;;  %v1424_v58 = vld [vmem:[#allocation10 + $0x30] sm:$0xff]  ;;  %v1423_v59 = vld [vmem:[#allocation10 + $0x28] sm:$0xff] }
 0x497   : > { %1830 = vmatpush3.msra.mxu0 %v1336_v26  ;;  %v1422_v60 = vld [vmem:[#allocation10 + $0x20] sm:$0xff]  ;;  %v1421_v61 = vld [vmem:[#allocation10 + $0x18] sm:$0xff]  ;;  %v1420_v0 = vld [vmem:[#allocation10 + $0x10] sm:$0xff] }
 0x498   : > { %1831 = vmatprep.subr.mxu0 %v2156_v20  ;;  %v1419_v1 = vld [vmem:[#allocation10 + $0x8] sm:$0xff]  ;;  %v1418_v2 = vld [vmem:[#allocation10] sm:$0xff] }
 0x499   : > { %1832 = vmatpush3.msra.mxu0 %v1335_v27  ;;  %v1685_v3 = vld [vmem:[%s2501_s13] ss:$0 sm:$0xff] }
 0x49a   : > { %1833 = vmatprep.subr.mxu0 %v2156_v20  ;;  %v1686_v8 = vld [vmem:[%s2503_s15] ss:$0 sm:$0xff] }
 0x49b   : > { %1834 = vmatpush3.msra.mxu0 %v1334_v28 }
 0x49c   : > { %1835 = vmatprep.subr.mxu0 %v2156_v20 }
 0x49d   : > { %1836 = vmatpush3.msra.mxu0 %v1333_v29 }
 0x49e   : > { %1837 = vmatprep.subr.mxu0 %v2156_v20 }
 0x49f   : > { %1838 = vmatpush3.msra.mxu0 %v1332_v30 }
 0x4a0   : > { %1839 = vmatprep.subr.mxu0 %v2156_v20 }
 0x4a1   : > { %1840 = vmatpush3.msra.mxu0 %v1331_v31 }
 0x4a2   : > { %1841 = vmatprep.subr.mxu0 %v2156_v20 }
 0x4a3   : > { %1842 = vmatpush3.msra.mxu0 %v1330_v32 }
 0x4a4   : > { %1843 = vmatprep.subr.mxu0 %v2156_v20 }
 0x4a5   : > { %1844 = vmatpush3.msra.mxu0 %v1329_v33 }
 0x4a6   : > { %1845 = vmatprep.subr.mxu0 %v2156_v20 }
 0x4a7   : > { %1846 = vmatpush3.msra.mxu0 %v1328_v34 }
 0x4a8   : > { %1847 = vmatprep.subr.mxu0 %v2156_v20 }
 0x4a9   : > { %1848 = vmatpush3.msra.mxu0 %v1327_v35 }
 0x4aa   : > { %1849 = vmatprep.subr.mxu0 %v2156_v20 }
 0x4ab   : > { %1850 = vmatpush3.msra.mxu0 %v1326_v36 }
 0x4ac   : > { %1851 = vmatprep.subr.mxu0 %v2156_v20 }
 0x4ad   : > { %1852 = vmatpush3.msra.mxu0 %v1325_v37 }
 0x4ae   : > { %1853 = vmatprep.subr.mxu0 %v2156_v20 }
 0x4af   : > { %1854 = vmatpush3.msra.mxu0 %v1324_v49 }
 0x51e   : > { %v1160_v38 = vpop.xlane.xlu0 %1159 }
 0x51f   : > { %v1161_v39 = vadd.f32 1e-16, %v1160_v38 }
 0x521   : > { %1969 = vrcp.f32 %v1161_v39 }
 0x52e   : > { %v1970_v40 = vpop.eup %1969 }
 0x52f   : > { %v1244_v41 = vmul.f32 %v1970_v40, %v1157_v21 }
 0x531   : > { %v1246_v44 = vmul.f32 %v1245_v43, %v1244_v41 }
 0x54f   : > { %v1240_v45 = vpop.f32.mrf.mxu0 }
 0x550   : > { %v1247_v46 = vadd.f32 %v1246_v44, %v1240_v45 }
 0x551   : > { %v1817_v48 = vpop.f32.mrf.mxu0 }
 0x552   : > { %1248 = vst [vmem:[#allocation11] sm:$0xff] %v1247_v46  ;;  %1819 = vmatpush3.msra.mxu1 %v1247_v46 }
 0x553   : > { %1821 = vmatmul.mubr.msk.f32.vlgmr.msra.gmra.mxu1 %vm907_vm7, %v1249_v47  ;;  %1858 = vmatprep.subr.mxu1 %v2156_v20 }
 0x554   : > { %1890 = vmatprep.mubr.msk.f32.mxu1 %vm2157_vm13, %v2156_v20  ;;  %1859 = vmatpush3.msra.mxu1 %v1433_v42 }
 0x555   : > { %1860 = vmatprep.subr.mxu1 %v2156_v20 }
 0x556   : > { %1861 = vmatpush3.msra.mxu1 %v1432_v50 }
 0x557   : > { %1862 = vmatprep.subr.mxu1 %v2156_v20 }
 0x558   : > { %1863 = vmatpush3.msra.mxu1 %v1431_v51 }
 0x559   : > { %1864 = vmatprep.subr.mxu1 %v2156_v20 }
 0x55a   : > { %1865 = vmatpush3.msra.mxu1 %v1430_v52 }
 0x55b   : > { %1866 = vmatprep.subr.mxu1 %v2156_v20 }
 0x55c   : > { %1867 = vmatpush3.msra.mxu1 %v1429_v53 }
 0x55d   : > { %1868 = vmatprep.subr.mxu1 %v2156_v20 }
 0x55e   : > { %1869 = vmatpush3.msra.mxu1 %v1428_v54 }
 0x55f   : > { %1870 = vmatprep.subr.mxu1 %v2156_v20 }
 0x560   : > { %1871 = vmatpush3.msra.mxu1 %v1427_v55 }
 0x561   : > { %1872 = vmatprep.subr.mxu1 %v2156_v20 }
 0x562   : > { %1873 = vmatpush3.msra.mxu1 %v1426_v56 }
 0x563   : > { %1874 = vmatprep.subr.mxu1 %v2156_v20 }
 0x564   : > { %1875 = vmatpush3.msra.mxu1 %v1425_v57 }
 0x565   : > { %1876 = vmatprep.subr.mxu1 %v2156_v20 }
 0x566   : > { %1877 = vmatpush3.msra.mxu1 %v1424_v58 }
 0x567   : > { %1878 = vmatprep.subr.mxu1 %v2156_v20 }
 0x568   : > { %1879 = vmatpush3.msra.mxu1 %v1423_v59 }
 0x569   : > { %1880 = vmatprep.subr.mxu1 %v2156_v20 }
 0x56a   : > { %1881 = vmatpush3.msra.mxu1 %v1422_v60 }
 0x56b   : > { %1882 = vmatprep.subr.mxu1 %v2156_v20 }
 0x56c   : > { %1883 = vmatpush3.msra.mxu1 %v1421_v61 }
 0x56d   : > { %1884 = vmatprep.subr.mxu1 %v2156_v20 }
 0x56e   : > { %1885 = vmatpush3.msra.mxu1 %v1420_v0 }
 0x56f   : > { %1886 = vmatprep.subr.mxu1 %v2156_v20 }
 0x570   : > { %1887 = vmatpush3.msra.mxu1 %v1419_v1 }
 0x571   : > { %1888 = vmatprep.subr.mxu1 %v2156_v20 }
 0x572   : > { %1889 = vmatpush3.msra.mxu1 %v1418_v2 }
 0x613   : > { %v1319_v62 = vpop.f32.mrf.mxu1 }
 0x614   : > { %1323 = vst [vmem:[#allocation12] sm:$0x3] %v1319_v62  ;;  %1856 = vmatmul.mubr.f32.vlgmr.msra.gmra.mxu0 %v1319_v62 }
 0x615   : > { %v1822_v63 = vpop.f32.mrf.mxu1 }
 0x6d4   : > { %v1413_v4 = vpop.f32.mrf.mxu0 }
 0x6d5   : > { %v1414_v5 = vadd.f32 %v1685_v3, %v1413_v4 }
 0x6d6   : > { %v1857_v6 = vpop.f32.mrf.mxu0 }
 0x6d7   : > { %v1417_v7 = vmax.f32 %v1414_v5, 0.0 }
 0x6d9   : > { %1891 = vmatmul.mubr.f32.vlgmr.msra.gmra.mxu1 %v1417_v7 }
 0x799   : > { %v1507_v9 = vpop.f32.mrf.mxu1 }
 0x79a   : > { %v1508_v10 = vadd.f32 %v1686_v8, %v1507_v9 }
 0x79b   : > { %v1892_v11 = vpop.f32.mrf.mxu1 }
 0x79c   : > { %1511 = vst [vmem:[#allocation14] sm:$0x3] %v1508_v10 }
 0x79d PF: > { %p1933_p6 = scmp.eq.s32.totalorder %s2262_s28, 2  ;;  %s2158_s24 = smov [#allocation12]  }
 0x79e   : > { %s1530_s26 = sshll.u32 %s2158_s24, 4  ;;  %s2159_s30 = smov [#allocation11]   ;;  %s1531_s26 = int_to_ptr.vmem [resolvable:$true] %s1530_s26 }
 0x79f   : > { %s1519_s19 = sshll.u32 %s2159_s30, 4  ;;  %s2049_s21 = scalar_lea.vmem %s1531_s26, 32  ;;  %s1520_s19 = int_to_ptr.vmem [resolvable:$true] %s1519_s19 }
 0x7a0   : > { %p2050_p9 = scmp.ne.s32.totalorder %s1531_s26, %s2049_s21  ;;  %p2056_p12 = scmp.lt.s32.totalorder %s1531_s26, %s1531_s26 }
 0x7a1   : > { %p2057_p13 = scmp.lt.s32.totalorder %s2049_s21, %s2049_s21 }
 0x7a2   : > { %p2051_p11 = pnand %p2050_p9, %p1933_p6 }
 0x7a3   : > { %p2058_p0 = por %p2057_p13, %p2056_p12 }
 0x7a4   : > { %p2052_p10 = pneg %p2051_p11 }
 0x7a6   : > { %p2059_p2 = pnand %p2058_p0, %p2052_p10 }
 0x7a8   : > { %2062 = shalt.err (!%p2059_p2)
}
 0x7a9   : > { %1908 = dma.vmem_to_hbm [thread:$0]  (%p1933_p6), %s1531_s26, 32, %s2505_s17, [#allocation13]  }
 0x7aa   : > { %s2073_s2 = scalar_lea.vmem %s1520_s19, 128  ;;  %p2080_p7 = scmp.lt.s32.totalorder %s1520_s19, %s1520_s19 }
 0x7ab   : > { %p2074_p1 = scmp.ne.s32.totalorder %s1520_s19, %s2073_s2  ;;  %p2081_p3 = scmp.lt.s32.totalorder %s2073_s2, %s2073_s2 }
 0x7ad   : > { %p2075_p5 = pnand %p2074_p1, %p1933_p6  ;;  %p2082_p4 = por %p2081_p3, %p2080_p7 }
 0x7af   : > { %p2076_p8 = pneg %p2075_p5 }
 0x7b1   : > { %p2083_p9 = pnand %p2082_p4, %p2076_p8 }
 0x7b3   : > { %2086 = shalt.err (!%p2083_p9)
}
 0x7b4   : > { %1906 = dma.vmem_to_hbm [thread:$0]  (%p1933_p6), %s1520_s19, 128, %s2504_s16, [#allocation7]  }
 0x7b5   : > { %s2160_s20 = smov [#allocation14]  }
 0x7b6   : > { %s1541_s29 = sshll.u32 %s2160_s20, 4  ;;  %s1542_s29 = int_to_ptr.vmem [resolvable:$true] %s1541_s29 }
 0x7b7   : > { %s2097_s12 = scalar_lea.vmem %s1542_s29, 32  ;;  %p2104_p13 = scmp.lt.s32.totalorder %s1542_s29, %s1542_s29 }
 0x7b8   : > { %p2098_p11 = scmp.ne.s32.totalorder %s1542_s29, %s2097_s12  ;;  %p2105_p0 = scmp.lt.s32.totalorder %s2097_s12, %s2097_s12 }
 0x7ba   : > { %p2099_p10 = pnand %p2098_p11, %p1933_p6  ;;  %p2106_p2 = por %p2105_p0, %p2104_p13 }
 0x7bc   : > { %p2100_p12 = pneg %p2099_p10 }
 0x7be   : > { %p2107_p1 = pnand %p2106_p2, %p2100_p12 }
 0x7c0   : > { %2110 = shalt.err (!%p2107_p1)
}
 0x7c1   : > { %1910 = dma.vmem_to_hbm [thread:$0]  (%p1933_p6), %s1542_s29, 32, %s2506_s18, [#allocation13]  }
 0x7c2   : > { %2134 = dma.done.wait (%p1933_p6), [#allocation7], 128  }
 0x7c3   : > { %2136 = vsyncadd (%p1933_p6), [#allocation7], 4294967168 }
 0x7c4   : > { %2138 = dma.done.wait (%p1933_p6), [#allocation13], 64  }
 0x7c5   : > { %2140 = vsyncadd (%p1933_p6), [#allocation13], 4294967232 }
 0x7c6 PF: > { %s33_s27 = sadd.s32 1, %s2143_s27  }
 0x7c7   : > { %p30_p5 = scmp.ge.s32.totalorder %s33_s27, 5  }
 0x7c9   :  { %32 = sbr.rel (!%p30_p5) target bundleno = 11 (0xb), region = 154 }
 0x7ce   :  { %1562 = vsyncpa [#allocation6], 1 }
 0x7cf   :  { %1564 = vsyncpa [#allocation6 + $0x1], 1 }
 0x7d0   :  { %1565 = vsyncpa [#allocation9], 1 }
 0x7d1   :  { %1566 = vsyncpa [#allocation7], 1 }
 0x7d2   :  { %1568 = vsyncpa [#allocation7 + $0x1], 1 }
 0x7d3   :  { %1569 = vsyncpa [#allocation13], 1 }

</bundles_post_ra>
